<compile_context>
chip_gen: v6e
topology: v6e:2x2x1
jax: 0.10.0
libtpu: 0.0.40
codegen_flags: <defaults>
</compile_context>

<pallas_src>
import jax
import jax.numpy as jnp
from jax.experimental import pallas as pl
from jax.experimental.pallas import tpu as pltpu


_NEG_SLOPE = 0.01                    # PyTorch nn.LeakyReLU default
_TM_HARD_CAP = 4096                  # max batch-tile rows (review: 2048-4096)
_X_TILE_BUDGET_BYTES = 8 * 1024 * 1024   # budget for the double-buffered f32 x tile


def _leaky_relu(v):
    # max(v, slope*v) == where(v>=0, v, slope*v) for slope in (0,1); 2 VALU ops.
    return jnp.maximum(v, v * _NEG_SLOPE)


def _mlp_kernel(x_ref,
                w1_ref, b1_ref,
                w2_ref, b2_ref,
                w3_ref, b3_ref,
                w4_ref, b4_ref,
                out_ref):
    """One batch-tile of the 4-layer MLP. Weights stay VMEM-resident."""
    # Cast x to bf16 in-kernel: keeps a single HBM pass over x (no separate
    # wrapper-side cast kernel).
    x = x_ref[...].astype(jnp.bfloat16)

    # Layer 1: (TM, D) @ (D, 128) — bf16 operands, f32 MXU accumulation,
    # bf16 epilogue (bias + LeakyReLU).
    h = jnp.dot(x, w1_ref[...], preferred_element_type=jnp.float32)
    h = _leaky_relu(h.astype(jnp.bfloat16) + b1_ref[...])

    # Layer 2: (TM, 128) @ (128, 128)
    h = jnp.dot(h, w2_ref[...], preferred_element_type=jnp.float32)
    h = _leaky_relu(h.astype(jnp.bfloat16) + b2_ref[...])

    # Layer 3: (TM, 128) @ (128, 64)
    h = jnp.dot(h, w3_ref[...], preferred_element_type=jnp.float32)
    h = _leaky_relu(h.astype(jnp.bfloat16) + b3_ref[...])

    # Layer 4: degenerate N=1 matmul -> VPU multiply + XLU lane reduce (f32).
    logit = jnp.sum(h.astype(jnp.float32) * w4_ref[...],
                    axis=-1, keepdims=True) + b4_ref[...]

    # Sigmoid via a single EUP tanh (exact; replaces exp + approx reciprocal).
    out_ref[...] = (0.5 * (jnp.tanh(0.5 * logit) + 1.0)).astype(out_ref.dtype)


def _round_up(n, m):
    return ((n + m - 1) // m) * m


def _choose_tm(batch, input_dim):
    """Batch-tile rows: as large as the VMEM budget allows, >=2 tiles for v7x."""
    # Cap from the double-buffered f32 x tile; keeps total VMEM (x bufs + out
    # bufs + weights + activations) comfortably under the 32 MiB scoped limit
    # (v7x's 64 MiB physical VMEM included).
    cap = _X_TILE_BUDGET_BYTES // (2 * 4 * max(input_dim, 1))
    cap = max(16, (cap // 16) * 16)          # multiple of 16 (bf16 sublane packing)
    tm = min(_TM_HARD_CAP, cap, batch)
    # v7x megacore: if the whole batch is one large tile, split it so the
    # "parallel" batch axis gives both TensorCores work.
    if tm == batch and batch >= 1024:
        tm = _round_up((batch + 1) // 2, 16)
    return tm


@jax.jit
def mlp_forward(x, params):
    """x: (batch, input_dim) f32. params: w1..w4 as (in,out), b1..b4 as (1,out)."""
    batch, input_dim = x.shape
    tm = _choose_tm(batch, input_dim)
    grid = pl.cdiv(batch, tm)   # ragged tail handled by Pallas boundary masking

    # bf16 matmul operands / epilogue params; final (1,64) row and b4 stay f32.
    w1 = params["w1"].astype(jnp.bfloat16)
    w2 = params["w2"].astype(jnp.bfloat16)
    w3 = params["w3"].astype(jnp.bfloat16)
    b1 = params["b1"].astype(jnp.bfloat16)
    b2 = params["b2"].astype(jnp.bfloat16)
    b3 = params["b3"].astype(jnp.bfloat16)
    w4_row = params["w4"].reshape(1, -1).astype(jnp.float32)   # (1, 64)
    b4 = params["b4"].astype(jnp.float32)                      # (1, 1)

    def pinned(arr):
        # Whole array, same block every grid step -> fetched once, stays in VMEM.
        return pl.BlockSpec(arr.shape, lambda i: (0,) * arr.ndim)

    out = pl.pallas_call(
        _mlp_kernel,
        out_shape=jax.ShapeDtypeStruct((batch, 1), jnp.float32),
        grid_spec=pltpu.PrefetchScalarGridSpec(
            num_scalar_prefetch=0,
            grid=(grid,),
            in_specs=[
                pl.BlockSpec((tm, input_dim), lambda i: (i, 0)),
                pinned(w1), pinned(b1),
                pinned(w2), pinned(b2),
                pinned(w3), pinned(b3),
                pinned(w4_row), pinned(b4),
            ],
            out_specs=pl.BlockSpec((tm, 1), lambda i: (i, 0)),
        ),
        compiler_params=pltpu.CompilerParams(
            dimension_semantics=("parallel",),
            vmem_limit_bytes=32 * 1024 * 1024),
    )(x, w1, b1, w2, b2, w3, b3, w4_row, b4)

    return out


def init_params(key, input_dim):
    """Deterministic init mirroring PyTorch nn.Linear default (U(-1/sqrt(fan_in), +))."""
    dims = [(input_dim, 128), (128, 128), (128, 64), (64, 1)]
    params = {}
    for idx, (fan_in, fan_out) in enumerate(dims, start=1):
        key, kw, kb = jax.random.split(key, 3)
        bound = 1.0 / jnp.sqrt(jnp.float32(fan_in))
        params[f"w{idx}"] = jax.random.uniform(
            kw, (fan_in, fan_out), jnp.float32, -bound, bound)
        params[f"b{idx}"] = jax.random.uniform(
            kb, (1, fan_out), jnp.float32, -bound, bound)
    return params


def _reference_forward(x, params):
    def leaky(v):
        return jnp.where(v >= 0, v, 0.01 * v)
    h = leaky(x @ params["w1"] + params["b1"])
    h = leaky(h @ params["w2"] + params["b2"])
    h = leaky(h @ params["w3"] + params["b3"])
    h = h @ params["w4"] + params["b4"]
    return jax.nn.sigmoid(h)


if __name__ == "__main__":
    key = jax.random.PRNGKey(0)
    k_param, k_x = jax.random.split(key)

    input_dim = 32
    batch = 8

    params = init_params(k_param, input_dim)
    x = jax.random.normal(k_x, (batch, input_dim), jnp.float32)

    out = mlp_forward(x, params)
    out = jax.block_until_ready(out)

    ref = _reference_forward(x, params)
    assert out.shape == (batch, 1), out.shape
    # bf16 matmul operands + bf16 epilogues -> loosened tolerance vs f32 reference.
    assert jnp.allclose(out, ref, atol=2e-2, rtol=2e-2), (out, ref)

    print("KERNEL_OK")
</pallas_src>

<mosaic_0001>
module attributes {stable_mosaic.version = 11 : i64} {
  func.func @_mlp_kernel(%arg0: i32, %arg1: memref<8x32xf32, #tpu.memory_space<vmem>>, %arg2: memref<32x128xbf16, #tpu.memory_space<vmem>>, %arg3: memref<1x128xbf16, #tpu.memory_space<vmem>>, %arg4: memref<128x128xbf16, #tpu.memory_space<vmem>>, %arg5: memref<1x128xbf16, #tpu.memory_space<vmem>>, %arg6: memref<128x64xbf16, #tpu.memory_space<vmem>>, %arg7: memref<1x64xbf16, #tpu.memory_space<vmem>>, %arg8: memref<1x64xf32, #tpu.memory_space<vmem>>, %arg9: memref<1x1xf32, #tpu.memory_space<vmem>>, %arg10: memref<8x1xf32, #tpu.memory_space<vmem>>) attributes {dimension_semantics = [#tpu.dimension_semantics<parallel>], iteration_bounds = array<i64: 1>, scalar_prefetch = 0 : i64, scratch_operands = 0 : i64, tpu.core_type = #tpu.core_type<tc>, window_params = [{transform_indices = @transform_0, window_bounds = array<i64: 8, 32>}, {pipeline_mode = #tpu.pipeline_mode<synchronous>, transform_indices = @transform_1, window_bounds = array<i64: 32, 128>}, {pipeline_mode = #tpu.pipeline_mode<synchronous>, transform_indices = @transform_2, window_bounds = array<i64: 1, 128>}, {pipeline_mode = #tpu.pipeline_mode<synchronous>, transform_indices = @transform_3, window_bounds = array<i64: 128, 128>}, {pipeline_mode = #tpu.pipeline_mode<synchronous>, transform_indices = @transform_4, window_bounds = array<i64: 1, 128>}, {pipeline_mode = #tpu.pipeline_mode<synchronous>, transform_indices = @transform_5, window_bounds = array<i64: 128, 64>}, {pipeline_mode = #tpu.pipeline_mode<synchronous>, transform_indices = @transform_6, window_bounds = array<i64: 1, 64>}, {pipeline_mode = #tpu.pipeline_mode<synchronous>, transform_indices = @transform_7, window_bounds = array<i64: 1, 64>}, {pipeline_mode = #tpu.pipeline_mode<synchronous>, transform_indices = @transform_8, window_bounds = array<i64: 1, 1>}, {transform_indices = @transform_9, window_bounds = array<i64: 8, 1>}]} {
    %c0 = arith.constant 0 : index
    %c0_0 = arith.constant 0 : index
    %0 = vector.load %arg1[%c0, %c0_0] : memref<8x32xf32, #tpu.memory_space<vmem>>, vector<8x32xf32>
    %1 = arith.truncf %0 : vector<8x32xf32> to vector<8x32xbf16>
    %c0_1 = arith.constant 0 : index
    %c0_2 = arith.constant 0 : index
    %2 = vector.load %arg2[%c0_1, %c0_2] : memref<32x128xbf16, #tpu.memory_space<vmem>>, vector<32x128xbf16>
    %cst = arith.constant dense<0.000000e+00> : vector<8x128xf32>
    %3 = tpu.matmul %1, %2, %cst {dimension_numbers = #tpu.dot_dimension_numbers<[1], [0], [0], [1], [0, 0, 1, 1], [], []>} : vector<8x32xbf16>, vector<32x128xbf16>, vector<8x128xf32> -> vector<8x128xf32>
    %4 = arith.truncf %3 : vector<8x128xf32> to vector<8x128xbf16>
    %c0_3 = arith.constant 0 : index
    %c0_4 = arith.constant 0 : index
    %5 = vector.load %arg3[%c0_3, %c0_4] : memref<1x128xbf16, #tpu.memory_space<vmem>>, vector<1x128xbf16>
    %6 = vector.broadcast %5 : vector<1x128xbf16> to vector<8x128xbf16>
    %7 = arith.addf %4, %6 : vector<8x128xbf16>
    %cst_5 = arith.constant 1.000980e-02 : bf16
    %8 = vector.broadcast %cst_5 : bf16 to vector<8x128xbf16>
    %9 = arith.mulf %7, %8 : vector<8x128xbf16>
    %10 = arith.maximumf %7, %9 : vector<8x128xbf16>
    %c0_6 = arith.constant 0 : index
    %c0_7 = arith.constant 0 : index
    %11 = vector.load %arg4[%c0_6, %c0_7] : memref<128x128xbf16, #tpu.memory_space<vmem>>, vector<128x128xbf16>
    %cst_8 = arith.constant dense<0.000000e+00> : vector<8x128xf32>
    %12 = tpu.matmul %10, %11, %cst_8 {dimension_numbers = #tpu.dot_dimension_numbers<[1], [0], [0], [1], [0, 0, 1, 1], [], []>} : vector<8x128xbf16>, vector<128x128xbf16>, vector<8x128xf32> -> vector<8x128xf32>
    %13 = arith.truncf %12 : vector<8x128xf32> to vector<8x128xbf16>
    %c0_9 = arith.constant 0 : index
    %c0_10 = arith.constant 0 : index
    %14 = vector.load %arg5[%c0_9, %c0_10] : memref<1x128xbf16, #tpu.memory_space<vmem>>, vector<1x128xbf16>
    %15 = vector.broadcast %14 : vector<1x128xbf16> to vector<8x128xbf16>
    %16 = arith.addf %13, %15 : vector<8x128xbf16>
    %cst_11 = arith.constant 1.000980e-02 : bf16
    %17 = vector.broadcast %cst_11 : bf16 to vector<8x128xbf16>
    %18 = arith.mulf %16, %17 : vector<8x128xbf16>
    %19 = arith.maximumf %16, %18 : vector<8x128xbf16>
    %c0_12 = arith.constant 0 : index
    %c0_13 = arith.constant 0 : index
    %20 = vector.load %arg6[%c0_12, %c0_13] : memref<128x64xbf16, #tpu.memory_space<vmem>>, vector<128x64xbf16>
    %cst_14 = arith.constant dense<0.000000e+00> : vector<8x64xf32>
    %21 = tpu.matmul %19, %20, %cst_14 {dimension_numbers = #tpu.dot_dimension_numbers<[1], [0], [0], [1], [0, 0, 1, 1], [], []>} : vector<8x128xbf16>, vector<128x64xbf16>, vector<8x64xf32> -> vector<8x64xf32>
    %22 = arith.truncf %21 : vector<8x64xf32> to vector<8x64xbf16>
    %c0_15 = arith.constant 0 : index
    %c0_16 = arith.constant 0 : index
    %23 = vector.load %arg7[%c0_15, %c0_16] : memref<1x64xbf16, #tpu.memory_space<vmem>>, vector<1x64xbf16>
    %24 = vector.broadcast %23 : vector<1x64xbf16> to vector<8x64xbf16>
    %25 = arith.addf %22, %24 : vector<8x64xbf16>
    %cst_17 = arith.constant 1.000980e-02 : bf16
    %26 = vector.broadcast %cst_17 : bf16 to vector<8x64xbf16>
    %27 = arith.mulf %25, %26 : vector<8x64xbf16>
    %28 = arith.maximumf %25, %27 : vector<8x64xbf16>
    %29 = arith.extf %28 : vector<8x64xbf16> to vector<8x64xf32>
    %c0_18 = arith.constant 0 : index
    %c0_19 = arith.constant 0 : index
    %30 = vector.load %arg8[%c0_18, %c0_19] : memref<1x64xf32, #tpu.memory_space<vmem>>, vector<1x64xf32>
    %31 = vector.broadcast %30 : vector<1x64xf32> to vector<8x64xf32>
    %32 = arith.mulf %29, %31 : vector<8x64xf32>
    %cst_20 = arith.constant dense<0.000000e+00> : vector<8xf32>
    %33 = vector.multi_reduction <add>, %32, %cst_20 [1] : vector<8x64xf32> to vector<8xf32>
    %34 = vector.shape_cast %33 : vector<8xf32> to vector<8x1xf32>
    %c0_21 = arith.constant 0 : index
    %c0_22 = arith.constant 0 : index
    %35 = vector.load %arg9[%c0_21, %c0_22] : memref<1x1xf32, #tpu.memory_space<vmem>>, vector<1x1xf32>
    %36 = vector.broadcast %35 : vector<1x1xf32> to vector<8x1xf32>
    %37 = arith.addf %34, %36 : vector<8x1xf32>
    %cst_23 = arith.constant 5.000000e-01 : f32
    %38 = vector.broadcast %cst_23 : f32 to vector<8x1xf32>
    %39 = arith.mulf %38, %37 : vector<8x1xf32>
    %40 = math.tanh %39 : vector<8x1xf32>
    %cst_24 = arith.constant 1.000000e+00 : f32
    %41 = vector.broadcast %cst_24 : f32 to vector<8x1xf32>
    %42 = arith.addf %40, %41 : vector<8x1xf32>
    %cst_25 = arith.constant 5.000000e-01 : f32
    %43 = vector.broadcast %cst_25 : f32 to vector<8x1xf32>
    %44 = arith.mulf %43, %42 : vector<8x1xf32>
    %c0_26 = arith.constant 0 : index
    %c0_27 = arith.constant 0 : index
    %45 = vector.load %arg10[%c0_26, %c0_27] : memref<8x1xf32, #tpu.memory_space<vmem>>, vector<8x1xf32>
    tpu.vector_store %arg10[%c0_26, %c0_27], %44 {strides = array<i32>} : memref<8x1xf32, #tpu.memory_space<vmem>>, vector<8x1xf32>,
    return
  }
  func.func @transform_0(%arg0: i32) -> (i32, i32) {
    %c0_i32 = arith.constant 0 : i32
    %c0_i32_0 = arith.constant 0 : i32
    return %arg0, %c0_i32 : i32, i32
  }
  func.func @transform_1(%arg0: i32) -> (i32, i32) {
    %c0_i32 = arith.constant 0 : i32
    %c0_i32_0 = arith.constant 0 : i32
    %c0_i32_1 = arith.constant 0 : i32
    return %c0_i32, %c0_i32_0 : i32, i32
  }
  func.func @transform_2(%arg0: i32) -> (i32, i32) {
    %c0_i32 = arith.constant 0 : i32
    %c0_i32_0 = arith.constant 0 : i32
    %c0_i32_1 = arith.constant 0 : i32
    return %c0_i32, %c0_i32_0 : i32, i32
  }
  func.func @transform_3(%arg0: i32) -> (i32, i32) {
    %c0_i32 = arith.constant 0 : i32
    %c0_i32_0 = arith.constant 0 : i32
    %c0_i32_1 = arith.constant 0 : i32
    return %c0_i32, %c0_i32_0 : i32, i32
  }
  func.func @transform_4(%arg0: i32) -> (i32, i32) {
    %c0_i32 = arith.constant 0 : i32
    %c0_i32_0 = arith.constant 0 : i32
    %c0_i32_1 = arith.constant 0 : i32
    return %c0_i32, %c0_i32_0 : i32, i32
  }
  func.func @transform_5(%arg0: i32) -> (i32, i32) {
    %c0_i32 = arith.constant 0 : i32
    %c0_i32_0 = arith.constant 0 : i32
    %c0_i32_1 = arith.constant 0 : i32
    return %c0_i32, %c0_i32_0 : i32, i32
  }
  func.func @transform_6(%arg0: i32) -> (i32, i32) {
    %c0_i32 = arith.constant 0 : i32
    %c0_i32_0 = arith.constant 0 : i32
    %c0_i32_1 = arith.constant 0 : i32
    return %c0_i32, %c0_i32_0 : i32, i32
  }
  func.func @transform_7(%arg0: i32) -> (i32, i32) {
    %c0_i32 = arith.constant 0 : i32
    %c0_i32_0 = arith.constant 0 : i32
    %c0_i32_1 = arith.constant 0 : i32
    return %c0_i32, %c0_i32_0 : i32, i32
  }
  func.func @transform_8(%arg0: i32) -> (i32, i32) {
    %c0_i32 = arith.constant 0 : i32
    %c0_i32_0 = arith.constant 0 : i32
    %c0_i32_1 = arith.constant 0 : i32
    return %c0_i32, %c0_i32_0 : i32, i32
  }
  func.func @transform_9(%arg0: i32) -> (i32, i32) {
    %c0_i32 = arith.constant 0 : i32
    %c0_i32_0 = arith.constant 0 : i32
    return %arg0, %c0_i32 : i32, i32
  }
}

</mosaic_0001>

<bundles_post_ra>
// kernel: mlp_forward.1
= control target key start
LH: loop header
LB: loop body
LE: loop exit
PB: predicated region body
PF: predicated region fallthrough
CT: control target
= control target key end

     0   :  { %v485_v0 = vmov 0.0   ;;  %vm486_vm0 = vmmov 0   ;;  %vm54_vm1 = vcmask 261120   ;;  %v103_v19 = vlaneseq  ;;  %s636_s1 = inlined_call_operand.vmem [shape: bf16[32,128], index: 1, kind: input, shape index: {}]   ;;  %s637_s0 = inlined_call_operand.vmem [shape: f32[8,32], index: 0, kind: input, shape index: {}]   ;;  %s638_s3 = inlined_call_operand.vmem [shape: bf16[128,128], index: 3, kind: input, shape index: {}]   ;;  %s639_s5 = inlined_call_operand.vmem [shape: bf16[128,64], index: 5, kind: input, shape index: {}]   ;;  %s640_s2 = inlined_call_operand.vmem [shape: bf16[1,128], index: 2, kind: input, shape index: {}]   ;;  %s641_s4 = inlined_call_operand.vmem [shape: bf16[1,128], index: 4, kind: input, shape index: {}]   ;;  %s642_s8 = inlined_call_operand.<no memory space> [shape: f32[1,1], index: 8, kind: input, shape index: {}]   ;;  %s643_s6 = inlined_call_operand.vmem [shape: bf16[1,64], index: 6, kind: input, shape index: {}]   ;;  %s644_s7 = inlined_call_operand.vmem [shape: f32[1,64], index: 7, kind: input, shape index: {}]   ;;  %s645_s9 = inlined_call_operand.vmem [shape: f32[8,1], index: 9, kind: output, shape index: {}]  }
   0x1   :  { %415 = vmatprep.subr.bf16.mxu0 %v485_v0  ;;  %v465_v1 = vld [vmem:[%s636_s1 + $0x8] sm:$0xff]   ;;  %419 = vmatprep.mubr.msk.bf16.mxu0 %vm486_vm0, %v485_v0  ;;  %v466_v2 = vld [vmem:[%s636_s1] sm:$0xff]   ;;  %v467_v4 = vld [vmem:[%s638_s3 + $0x38] sm:$0xff]   ;;  %v14_v46 = vstv %s642_s8  ;;  %vm351_vm2 = vcmask 523264   ;;  %vm367_vm3 = vcmask 7168  }
   0x2   :  { %423 = vmatprep.subr.bf16.mxu1 %v485_v0  ;;  %439 = vmatprep.mubr.msk.bf16.mxu1 %vm486_vm0, %v485_v0  ;;  %v36_v3 = vld [vmem:[%s637_s0] sm:$0xff]  ;;  %v468_v6 = vld [vmem:[%s638_s3 + $0x30] sm:$0xff]   ;;  %v469_v7 = vld [vmem:[%s638_s3 + $0x28] sm:$0xff]   ;;  %v104_v20 = vshrl.u32 %v103_v19, 7  ;;  %15 = vst [vmem:[#allocation2] sm:$0x1] %v14_v46 }
   0x3   :  { %416 = vmatpush3.bf16.msra.mxu0 %v465_v1  ;;  %v37_v5 = vpack.c.bf16 %v36_v3, %v36_v3  ;;  %424 = vmatpush3.bf16.msra.mxu1 %v467_v4  ;;  %v470_v8 = vld [vmem:[%s638_s3 + $0x20] sm:$0xff]   ;;  %v471_v9 = vld [vmem:[%s638_s3 + $0x18] sm:$0xff]   ;;  %v472_v10 = vld [vmem:[%s638_s3 + $0x10] sm:$0xff]  }
   0x4   :  { %417 = vmatprep.subr.bf16.mxu0 %v485_v0  ;;  %425 = vmatprep.subr.bf16.mxu1 %v485_v0  ;;  %v473_v11 = vld [vmem:[%s638_s3 + $0x8] sm:$0xff]   ;;  %v474_v12 = vld [vmem:[%s638_s3] sm:$0xff]   ;;  %v475_v13 = vld [vmem:[%s639_s5 + $0x38] sm:$0xff]   ;;  %v105_v23 = vsub.s32 0, %v104_v20 }
   0x5   :  { %v476_v14 = vld [vmem:[%s639_s5 + $0x30] sm:$0xff]   ;;  %v477_v15 = vld [vmem:[%s639_s5 + $0x28] sm:$0xff]   ;;  %v478_v16 = vld [vmem:[%s639_s5 + $0x20] sm:$0xff]  }
   0x6   :  { %v479_v17 = vld [vmem:[%s639_s5 + $0x18] sm:$0xff]   ;;  %v480_v18 = vld [vmem:[%s639_s5 + $0x10] sm:$0xff]   ;;  %v99_v21 = vld [vmem:[%s640_s2] sm:$0x1] }
   0x7   :  { %418 = vmatpush3.bf16.msra.mxu0 %v466_v2  ;;  %426 = vmatpush3.bf16.msra.mxu1 %v468_v6  ;;  %v101_v22 = vpack.i.b16 %v99_v21, %v99_v21  ;;  %v481_v33 = vld [vmem:[%s639_s5 + $0x8] sm:$0xff]   ;;  %v482_v34 = vld [vmem:[%s639_s5] sm:$0xff]  }
   0x8   :  { %443 = vmatprep.subr.bf16.mxu0 %v485_v0  ;;  %427 = vmatprep.subr.bf16.mxu1 %v485_v0  ;;  %v215_v35 = vld [vmem:[%s641_s4] sm:$0x1] }
   0x9   :  { %v106_v24 = vrot.slane %v101_v22, %v105_v23  ;;  %v217_v36 = vpack.i.b16 %v215_v35, %v215_v35  ;;  %v331_v47 = vld [vmem:[%s643_s6] sm:$0x1] }
   0xa   :  { %420 = vmatmul.mubr.msk.bf16.vlgmr.msra.gmra.mxu0 %vm54_vm1, %v37_v5  ;;  %v333_v48 = vpack.i.b16 %v331_v47, %v331_v47  ;;  %v392_v58 = vld [vmem:[%s644_s7] ss:$0 sm:$0xff] }
   0xb   :  { %459 = vmatprep.mubr.msk.bf16.mxu0 %vm486_vm0, %v485_v0  ;;  %428 = vmatpush3.bf16.msra.mxu1 %v469_v7  ;;  %v222_v37 = vrot.slane %v217_v36, %v105_v23  ;;  %v393_v62 = vld [vmem:[#allocation2] ss:$0 sm:$0xff] }
   0xc   :  { %429 = vmatprep.subr.bf16.mxu1 %v485_v0  ;;  %444 = vmatpush3.bf16.msra.mxu0 %v475_v13  ;;  %v338_v49 = vrot.slane %v333_v48, %v105_v23 }
   0xd   :  { %445 = vmatprep.subr.bf16.mxu0 %v485_v0 }
   0xf   :  { %430 = vmatpush3.bf16.msra.mxu1 %v470_v8 }
  0x10   :  { %431 = vmatprep.subr.bf16.mxu1 %v485_v0  ;;  %446 = vmatpush3.bf16.msra.mxu0 %v476_v14 }
  0x11   :  { %447 = vmatprep.subr.bf16.mxu0 %v485_v0 }
  0x13   :  { %432 = vmatpush3.bf16.msra.mxu1 %v471_v9 }
  0x14   :  { %433 = vmatprep.subr.bf16.mxu1 %v485_v0  ;;  %448 = vmatpush3.bf16.msra.mxu0 %v477_v15 }
  0x15   :  { %449 = vmatprep.subr.bf16.mxu0 %v485_v0 }
  0x17   :  { %434 = vmatpush3.bf16.msra.mxu1 %v472_v10 }
  0x18   :  { %435 = vmatprep.subr.bf16.mxu1 %v485_v0  ;;  %450 = vmatpush3.bf16.msra.mxu0 %v478_v16 }
  0x19   :  { %451 = vmatprep.subr.bf16.mxu0 %v485_v0 }
  0x1b   :  { %436 = vmatpush3.bf16.msra.mxu1 %v473_v11 }
  0x1c   :  { %437 = vmatprep.subr.bf16.mxu1 %v485_v0  ;;  %452 = vmatpush3.bf16.msra.mxu0 %v479_v17 }
  0x1d   :  { %453 = vmatprep.subr.bf16.mxu0 %v485_v0 }
  0x1f   :  { %438 = vmatpush3.bf16.msra.mxu1 %v474_v12 }
  0x20   :  { %454 = vmatpush3.bf16.msra.mxu0 %v480_v18 }
  0x21   :  { %455 = vmatprep.subr.bf16.mxu0 %v485_v0 }
  0x24   :  { %456 = vmatpush3.bf16.msra.mxu0 %v481_v33 }
  0x25   :  { %457 = vmatprep.subr.bf16.mxu0 %v485_v0 }
  0x28   :  { %458 = vmatpush3.bf16.msra.mxu0 %v482_v34 }
  0xca   :  { %v92_v25 = vpop.f32.mrf.mxu0 }
  0xcb   :  { %v98_v26 = vpack.c.bf16 %v92_v25, %v92_v25 }
  0xcc   :  { %v421_v27 = vpop.f32.mrf.mxu0 }
  0xcd   :  { %v107_v28 = vadd.bf16 %v106_v24, %v98_v26 }
  0xce   :  { %v95_v29 = vpop.f32.mrf.mxu0 }
  0xcf   :  { %v108_v30 = vmul.bf16 1009007652, %v107_v28 }
  0xd0   :  { %v422_v31 = vpop.f32.mrf.mxu0 }
  0xd1   :  { %v109_v32 = vmax.bf16 %v108_v30, %v107_v28 }
  0xd3   :  { %440 = vmatmul.mubr.bf16.vlgmr.msra.gmra.mxu1 %v109_v32 }
 0x193   :  { %v208_v38 = vpop.f32.mrf.mxu1 }
 0x194   :  { %v214_v39 = vpack.c.bf16 %v208_v38, %v208_v38 }
 0x195   :  { %v441_v40 = vpop.f32.mrf.mxu1 }
 0x196   :  { %v223_v41 = vadd.bf16 %v222_v37, %v214_v39 }
 0x197   :  { %v211_v42 = vpop.f32.mrf.mxu1 }
 0x198   :  { %v224_v43 = vmul.bf16 1009007652, %v223_v41 }
 0x199   :  { %v442_v44 = vpop.f32.mrf.mxu1 }
 0x19a   :  { %v225_v45 = vmax.bf16 %v224_v43, %v223_v41 }
 0x19c   :  { %460 = vmatmul.mubr.bf16.vlgmr.msra.gmra.mxu0 %v225_v45 }
 0x25c   :  { %v324_v50 = vpop.f32.mrf.mxu0 }
 0x25d   :  { %v330_v51 = vpack.c.bf16 %v324_v50, %v324_v50 }
 0x25e   :  { %v461_v52 = vpop.f32.mrf.mxu0 }
 0x25f   :  { %v339_v53 = vadd.bf16 %v338_v49, %v330_v51 }
 0x260   :  { %v327_v54 = vpop.f32.mrf.mxu0 }
 0x261   :  { %v340_v55 = vmul.bf16 1009007652, %v339_v53 }
 0x262   :  { %v462_v56 = vpop.f32.mrf.mxu0 }
 0x263   :  { %v341_v57 = vmax.bf16 %v340_v55, %v339_v53 }
 0x265   :  { %v342_v59 = vunpack.c.l.bf16 %v341_v57 }
 0x267   :  { %v350_v60 = vmul.f32 %v392_v58, %v342_v59 }
 0x269   :  { %v352_v61 = vsel %vm351_vm2, %v350_v60, 0.0 }
 0x26a   :  { %353 = vadd.xlane.f32.xlu0 %v352_v61 }
 0x2f3   :  { %v354_v63 = vpop.xlane.xlu0 %353 }
 0x2f4   :  { %v362_v0 = vadd.f32 %v393_v62, %v354_v63 }
 0x2f6   :  { %v363_v1 = vmul.f32 0.5, %v362_v0 }
 0x2f8   :  { %483 = vtanh.f32 %v363_v1 }
 0x305   :  { %v484_v2 = vpop.eup %483 }
 0x306   :  { %v365_v3 = vadd.f32 1.0, %v484_v2 }
 0x308   :  { %v366_v4 = vmul.f32 0.5, %v365_v3 }
 0x30a   :  { %368 = vst.msk [vmem:[%s645_s9] sm:$0xff] %vm367_vm3, %v366_v4 }

</bundles_post_ra>
